<compile_context>
chip_gen: v7x
topology: tpu7x:2x2x1
jax: 0.10.0
libtpu: 0.0.40
codegen_flags: <defaults>
</compile_context>

<pallas_src>
import functools

import jax
import jax.numpy as jnp
from jax.experimental import pallas as pl
from jax.experimental.pallas import tpu as pltpu

input_size = 784
hidden_size = 500
num_classes = 10


def _round_up(x: int, m: int) -> int:
    return (x + m - 1) // m * m


def mlp_kernel(x_ref, w1_ref, b1_ref, w2_ref, b2_ref, o_ref):
    # x arrives in its original dtype (f32); cast to bf16 for the MXU operand
    # path here instead of materializing a padded bf16 copy in HBM.
    x = x_ref[...].astype(jnp.bfloat16)
    # fc1: bf16 operands on the MXU, f32 accumulation.
    h = jnp.dot(x, w1_ref[...], preferred_element_type=jnp.float32)
    # Bias + ReLU in f32 on the VPU (rides under the MXU/DMA bottleneck; avoids
    # bf16 VPU ops which v5e lacks).  Padded hidden columns stay exactly 0.
    h = jnp.maximum(h + b1_ref[...], 0.0)
    # fc2: cast activation back to bf16 for the MXU, accumulate f32.
    out = jnp.dot(h.astype(jnp.bfloat16), w2_ref[...],
                  preferred_element_type=jnp.float32)
    o_ref[...] = (out + b2_ref[...]).astype(o_ref.dtype)


def prepare_params(w1, b1, w2, b2):
    """One-time parameter prep (call once at init, reuse across forward calls).

    Pads the N dims to 128-lane multiples (hidden 500->512, classes 10->128)
    and casts weights to bf16.  The K dims stay unpadded (784 / 512) — Mosaic
    handles them and padded columns/rows contribute exact zeros.
    """
    in_f, hid = w1.shape
    out_f = w2.shape[1]
    hid_p = _round_up(hid, 128)    # 500 -> 512
    out_p = _round_up(out_f, 128)  # 10  -> 128

    w1p = jnp.zeros((in_f, hid_p), jnp.bfloat16).at[:, :hid].set(
        w1.astype(jnp.bfloat16))
    b1p = jnp.zeros((1, hid_p), jnp.float32).at[:, :hid].set(
        b1.astype(jnp.float32).reshape(1, hid))
    w2p = jnp.zeros((hid_p, out_p), jnp.bfloat16).at[:hid, :out_f].set(
        w2.astype(jnp.bfloat16))
    b2p = jnp.zeros((1, out_p), jnp.float32).at[:, :out_f].set(
        b2.astype(jnp.float32).reshape(1, out_f))
    return w1p, b1p, w2p, b2p


def _choose_bm(B: int, bm=None) -> int:
    if bm is not None:
        return _round_up(bm, 16)
    if B <= 16:
        # Single grid step; 16-sublane aligned (one bf16 vreg packs 16 rows).
        return _round_up(max(B, 1), 16)
    if B <= 1024:
        # >= 2 grid steps so dimension_semantics=("parallel",) can actually
        # shard the batch across v7x's two TensorCores (no-op on v5e/v6e).
        return _round_up(pl.cdiv(B, 2), 16)
    # Large batch: 256-multiple M tiles keep the 256-wide MXU (v6e/v7x) full
    # and are 128-aligned for v5e; the f32 x tile (512x784x4 B ~ 1.6 MiB, x2
    # buffers) stays well inside every generation's scoped-VMEM default, so no
    # explicit vmem_limit_bytes is needed.
    return 512


def neural_net_forward(x, w1p, b1p, w2p, b2p, *, num_classes, bm=None):
    """Pallas TPU forward pass of NeuralNet (fc1 -> ReLU -> fc2).

    x    : [B, in_f] float (any float dtype; cast to bf16 in-kernel)
    w1p..b2p : prepared params from prepare_params()
    Returns [B, num_classes] float32.
    """
    B, in_f = x.shape
    hid_p = w1p.shape[1]
    out_p = w2p.shape[1]

    bm_eff = _choose_bm(B, bm)
    b_pad = _round_up(B, bm_eff)
    # Only copy x when the tile doesn't divide the batch (zero rows; their
    # garbage outputs ReLU(b1)@w2+b2 are sliced away below — keep that slice).
    xp = x if b_pad == B else jnp.pad(x, ((0, b_pad - B), (0, 0)))

    grid = (b_pad // bm_eff,)

    out = pl.pallas_call(
        mlp_kernel,
        out_shape=jax.ShapeDtypeStruct((b_pad, out_p), jnp.float32),
        grid_spec=pl.GridSpec(
            grid=grid,
            in_specs=[
                # x: batch-tiled, moves with the grid (double-buffered DMA).
                # Trailing dim = full 784 (== array dim), f32, cast in-kernel.
                pl.BlockSpec((bm_eff, in_f), lambda i: (i, 0)),
                # Weights/biases: constant block index -> fetched once, resident.
                pl.BlockSpec((in_f, hid_p), lambda i: (0, 0)),
                pl.BlockSpec((1, hid_p), lambda i: (0, 0)),
                pl.BlockSpec((hid_p, out_p), lambda i: (0, 0)),
                pl.BlockSpec((1, out_p), lambda i: (0, 0)),
            ],
            out_specs=pl.BlockSpec((bm_eff, out_p), lambda i: (i, 0)),
        ),
        compiler_params=pltpu.CompilerParams(
            # Batch axis is independent -> shard across TensorCores on v7x.
            dimension_semantics=("parallel",),
        ),
    )(xp, w1p, b1p, w2p, b2p)

    return out[:B, :num_classes]


def _ref_f32(x, w1, b1, w2, b2):
    return jnp.maximum(x @ w1 + b1.reshape(1, -1), 0.0) @ w2 + b2.reshape(1, -1)


def _ref_bf16(x, w1, b1, w2, b2):
    h = jnp.dot(x.astype(jnp.bfloat16), w1.astype(jnp.bfloat16),
                preferred_element_type=jnp.float32) + b1.reshape(1, -1)
    h = jnp.maximum(h, 0.0)
    return jnp.dot(h.astype(jnp.bfloat16), w2.astype(jnp.bfloat16),
                   preferred_element_type=jnp.float32) + b2.reshape(1, -1)


if __name__ == "__main__":
    key = jax.random.PRNGKey(0)
    k_x, k_w1, k_b1, k_w2, k_b2, k_x2 = jax.random.split(key, 6)

    batch = 8
    # Deterministic "PyTorch-like" uniform init: U(-1/sqrt(fan_in), 1/sqrt(fan_in))
    bound1 = 1.0 / jnp.sqrt(jnp.float32(input_size))
    bound2 = 1.0 / jnp.sqrt(jnp.float32(hidden_size))

    x = jax.random.normal(k_x, (batch, input_size), dtype=jnp.float32)
    # Stored transposed relative to torch's (out, in) layout: [in, out]
    w1 = jax.random.uniform(k_w1, (input_size, hidden_size), jnp.float32,
                            -bound1, bound1)
    b1 = jax.random.uniform(k_b1, (1, hidden_size), jnp.float32, -bound1, bound1)
    w2 = jax.random.uniform(k_w2, (hidden_size, num_classes), jnp.float32,
                            -bound2, bound2)
    b2 = jax.random.uniform(k_b2, (1, num_classes), jnp.float32, -bound2, bound2)

    # One-time parameter prep (hoisted out of the forward path).
    params = prepare_params(w1, b1, w2, b2)
    jax.block_until_ready(params)

    fwd = jax.jit(functools.partial(neural_net_forward, num_classes=num_classes))

    # --- small-batch call (single grid step) ---
    out = fwd(x, *params)
    jax.block_until_ready(out)
    assert out.shape == (batch, num_classes)
    # Tight check against a bf16-operand / f32-accumulate reference (same math).
    assert jnp.allclose(out, _ref_bf16(x, w1, b1, w2, b2), atol=1e-3, rtol=1e-3)
    # Loose check against the pure-f32 torch-equivalent math (bf16 quantization).
    assert jnp.allclose(out, _ref_f32(x, w1, b1, w2, b2), atol=5e-2, rtol=5e-2)

    # --- larger batch: exercises the 2-step parallel grid + ragged-batch pad ---
    x2 = jax.random.normal(k_x2, (200, input_size), dtype=jnp.float32)
    out2 = fwd(x2, *params)   # default bm -> 112-row tiles, grid of 2
    jax.block_until_ready(out2)
    assert out2.shape == (200, num_classes)
    assert jnp.allclose(out2, _ref_bf16(x2, w1, b1, w2, b2), atol=1e-3, rtol=1e-3)
    assert jnp.allclose(out2, _ref_f32(x2, w1, b1, w2, b2), atol=5e-2, rtol=5e-2)

    print("KERNEL_OK")
</pallas_src>

<mosaic_0001>
module attributes {stable_mosaic.version = 11 : i64} {
  func.func @mlp_kernel(%arg0: i32, %arg1: memref<16x784xf32, #tpu.memory_space<vmem>>, %arg2: memref<784x512xbf16, #tpu.memory_space<vmem>>, %arg3: memref<1x512xf32, #tpu.memory_space<vmem>>, %arg4: memref<512x128xbf16, #tpu.memory_space<vmem>>, %arg5: memref<1x128xf32, #tpu.memory_space<vmem>>, %arg6: memref<16x128xf32, #tpu.memory_space<vmem>>) attributes {dimension_semantics = [#tpu.dimension_semantics<parallel>], iteration_bounds = array<i64: 1>, scalar_prefetch = 0 : i64, scratch_operands = 0 : i64, tpu.core_type = #tpu.core_type<tc>, window_params = [{transform_indices = @transform_0, window_bounds = array<i64: 16, 784>}, {pipeline_mode = #tpu.pipeline_mode<synchronous>, transform_indices = @transform_1, window_bounds = array<i64: 784, 512>}, {pipeline_mode = #tpu.pipeline_mode<synchronous>, transform_indices = @transform_2, window_bounds = array<i64: 1, 512>}, {pipeline_mode = #tpu.pipeline_mode<synchronous>, transform_indices = @transform_3, window_bounds = array<i64: 512, 128>}, {pipeline_mode = #tpu.pipeline_mode<synchronous>, transform_indices = @transform_4, window_bounds = array<i64: 1, 128>}, {transform_indices = @transform_5, window_bounds = array<i64: 16, 128>}]} {
    %c0 = arith.constant 0 : index
    %c0_0 = arith.constant 0 : index
    %0 = vector.load %arg1[%c0, %c0_0] : memref<16x784xf32, #tpu.memory_space<vmem>>, vector<16x784xf32>
    %1 = arith.truncf %0 : vector<16x784xf32> to vector<16x784xbf16>
    %c0_1 = arith.constant 0 : index
    %c0_2 = arith.constant 0 : index
    %2 = vector.load %arg2[%c0_1, %c0_2] : memref<784x512xbf16, #tpu.memory_space<vmem>>, vector<784x512xbf16>
    %cst = arith.constant dense<0.000000e+00> : vector<16x512xf32>
    %3 = tpu.matmul %1, %2, %cst {dimension_numbers = #tpu.dot_dimension_numbers<[1], [0], [0], [1], [0, 0, 1, 1], [], []>} : vector<16x784xbf16>, vector<784x512xbf16>, vector<16x512xf32> -> vector<16x512xf32>
    %c0_3 = arith.constant 0 : index
    %c0_4 = arith.constant 0 : index
    %4 = vector.load %arg3[%c0_3, %c0_4] : memref<1x512xf32, #tpu.memory_space<vmem>>, vector<1x512xf32>
    %5 = vector.broadcast %4 : vector<1x512xf32> to vector<16x512xf32>
    %6 = arith.addf %3, %5 : vector<16x512xf32>
    %cst_5 = arith.constant 0.000000e+00 : f32
    %7 = vector.broadcast %cst_5 : f32 to vector<16x512xf32>
    %8 = arith.maximumf %6, %7 : vector<16x512xf32>
    %9 = arith.truncf %8 : vector<16x512xf32> to vector<16x512xbf16>
    %c0_6 = arith.constant 0 : index
    %c0_7 = arith.constant 0 : index
    %10 = vector.load %arg4[%c0_6, %c0_7] : memref<512x128xbf16, #tpu.memory_space<vmem>>, vector<512x128xbf16>
    %cst_8 = arith.constant dense<0.000000e+00> : vector<16x128xf32>
    %11 = tpu.matmul %9, %10, %cst_8 {dimension_numbers = #tpu.dot_dimension_numbers<[1], [0], [0], [1], [0, 0, 1, 1], [], []>} : vector<16x512xbf16>, vector<512x128xbf16>, vector<16x128xf32> -> vector<16x128xf32>
    %c0_9 = arith.constant 0 : index
    %c0_10 = arith.constant 0 : index
    %12 = vector.load %arg5[%c0_9, %c0_10] : memref<1x128xf32, #tpu.memory_space<vmem>>, vector<1x128xf32>
    %13 = vector.broadcast %12 : vector<1x128xf32> to vector<16x128xf32>
    %14 = arith.addf %11, %13 : vector<16x128xf32>
    %c0_11 = arith.constant 0 : index
    %c0_12 = arith.constant 0 : index
    %15 = vector.load %arg6[%c0_11, %c0_12] : memref<16x128xf32, #tpu.memory_space<vmem>>, vector<16x128xf32>
    tpu.vector_store %arg6[%c0_11, %c0_12], %14 {strides = array<i32>} : memref<16x128xf32, #tpu.memory_space<vmem>>, vector<16x128xf32>,
    return
  }
  func.func @transform_0(%arg0: i32) -> (i32, i32) {
    %c0_i32 = arith.constant 0 : i32
    %c0_i32_0 = arith.constant 0 : i32
    return %arg0, %c0_i32 : i32, i32
  }
  func.func @transform_1(%arg0: i32) -> (i32, i32) {
    %c0_i32 = arith.constant 0 : i32
    %c0_i32_0 = arith.constant 0 : i32
    %c0_i32_1 = arith.constant 0 : i32
    return %c0_i32, %c0_i32_0 : i32, i32
  }
  func.func @transform_2(%arg0: i32) -> (i32, i32) {
    %c0_i32 = arith.constant 0 : i32
    %c0_i32_0 = arith.constant 0 : i32
    %c0_i32_1 = arith.constant 0 : i32
    return %c0_i32, %c0_i32_0 : i32, i32
  }
  func.func @transform_3(%arg0: i32) -> (i32, i32) {
    %c0_i32 = arith.constant 0 : i32
    %c0_i32_0 = arith.constant 0 : i32
    %c0_i32_1 = arith.constant 0 : i32
    return %c0_i32, %c0_i32_0 : i32, i32
  }
  func.func @transform_4(%arg0: i32) -> (i32, i32) {
    %c0_i32 = arith.constant 0 : i32
    %c0_i32_0 = arith.constant 0 : i32
    %c0_i32_1 = arith.constant 0 : i32
    return %c0_i32, %c0_i32_0 : i32, i32
  }
  func.func @transform_5(%arg0: i32) -> (i32, i32) {
    %c0_i32 = arith.constant 0 : i32
    %c0_i32_0 = arith.constant 0 : i32
    return %arg0, %c0_i32 : i32, i32
  }
}

</mosaic_0001>

<bundles_post_ra>
// kernel: neural_net_forward.1
= control target key start
LH: loop header
LB: loop body
LE: loop exit
PB: predicated region body
PF: predicated region fallthrough
CT: control target
= control target key end

     0   :  { %10 = vsyncpa [#allocation3], 0  ;;  %s2784_s0 = inlined_call_operand.vmem [shape: f32[16,784], index: 0, kind: input, shape index: {}]   ;;  %s2785_s1 = inlined_call_operand.hbm [shape: bf16[784,512], index: 1, kind: input, shape index: {}]   ;;  %s2786_s2 = inlined_call_operand.vmem [shape: f32[1,512], index: 2, kind: input, shape index: {}]   ;;  %s2787_s3 = inlined_call_operand.hbm [shape: bf16[512,128], index: 3, kind: input, shape index: {}]   ;;  %s2788_s4 = inlined_call_operand.vmem [shape: f32[1,128], index: 4, kind: input, shape index: {}]   ;;  %s2789_s5 = inlined_call_operand.vmem [shape: f32[16,128], index: 5, kind: output, shape index: {}]  }
   0x1   :  { %11 = vsyncpa [#allocation5], 0  ;;  %s2669_s18 = smov [#allocation2]   ;;  %s2621_s22 = scalar_lea.hbm %s2785_s1, 25088 }
   0x2   :  { %s19_s19 = sshll.u32 %s2669_s18, 4  ;;  %p2622_p0 = scmp.ne.s32.totalorder %s2785_s1, %s2621_s22  ;;  %s20_s19 = int_to_ptr.vmem [resolvable:$true] %s19_s19 }
   0x3   :  { %p2625_p1 = scmp.lt.u32.totalorder %s2621_s22, %s2785_s1 }
   0x5   :  { %p2627_p2 = pnand %p2625_p1, %p2622_p0 }
   0x7   :  { %2630 = shalt.err (!%p2627_p2)
}
   0x8   :  { %s2631_s27 = scalar_lea.vmem %s20_s19, 25088  ;;  %p2636_p4 = scmp.lt.s32.totalorder %s20_s19, %s20_s19 }
   0x9   :  { %p2632_p3 = scmp.ne.s32.totalorder %s20_s19, %s2631_s27  ;;  %p2637_p5 = scmp.lt.s32.totalorder %s2631_s27, %s2631_s27 }
   0xb   :  { %p2638_p6 = por %p2637_p5, %p2636_p4 }
   0xd   :  { %p2639_p7 = pnand %p2638_p6, %p2632_p3 }
   0xf   :  { %2642 = shalt.err (!%p2639_p7)
}
  0x10   :  { %s2670_s28 = smov 256   ;;  %s2671_s29 = smov 16  }
  0x11   :  { %25 = dma.hbm_to_vmem [thread:$0]  %s2785_s1, 25088, %s20_s19, [#allocation3], %s2670_s28, %s2670_s28, %s2671_s29  }
  0x12   :  { %s2672_s7 = smov [#allocation4]   ;;  %s2643_s11 = scalar_lea.hbm %s2787_s3, 4096 }
  0x13   :  { %s33_s8 = sshll.u32 %s2672_s7, 4  ;;  %p2644_p8 = scmp.ne.s32.totalorder %s2787_s3, %s2643_s11  ;;  %s34_s8 = int_to_ptr.vmem [resolvable:$true] %s33_s8 }
  0x14   :  { %p2647_p9 = scmp.lt.u32.totalorder %s2643_s11, %s2787_s3 }
  0x16   :  { %p2649_p10 = pnand %p2647_p9, %p2644_p8 }
  0x18   :  { %2652 = shalt.err (!%p2649_p10)
}
  0x19   :  { %s2653_s16 = scalar_lea.vmem %s34_s8, 4096  ;;  %p2658_p12 = scmp.lt.s32.totalorder %s34_s8, %s34_s8 }
  0x1a   :  { %p2654_p11 = scmp.ne.s32.totalorder %s34_s8, %s2653_s16  ;;  %p2659_p13 = scmp.lt.s32.totalorder %s2653_s16, %s2653_s16 }
  0x1c   :  { %p2660_p0 = por %p2659_p13, %p2658_p12 }
  0x1e   :  { %p2661_p1 = pnand %p2660_p0, %p2654_p11 }
  0x20   :  { %2664 = shalt.err (!%p2661_p1)
}
  0x21   :  { %s2673_s1 = smov 64   ;;  %s2674_s17 = smov 4  }
  0x22   :  { %39 = dma.hbm_to_vmem [thread:$0]  %s2787_s3, 4096, %s34_s8, [#allocation5], %s2673_s1, %s2673_s1, %s2674_s17  }
  0x23   :  { %2665 = dma.done.wait [#allocation3], 25088  }
  0x24   :  { %2666 = vsyncadd [#allocation3], 4294942208 }
  0x25   :  { %2667 = dma.done.wait [#allocation5], 4096  }
  0x26   :  { %2668 = vsyncadd [#allocation5], 4294963200  ;;  %v2295_v0 = vld [vmem:[#allocation2 + $0x4] ss:$16 sps:$4 sm:$0xff]   ;;  %v2297_v1 = vld [vmem:[#allocation2 + $0xc] ss:$16 sps:$4 sm:$0xff]  }
  0x27   :  { %1272 = vmatprep.subr.bf16.mxu0 %v2295_v0  ;;  %v2299_v2 = vld [vmem:[#allocation2] ss:$16 sps:$4 sm:$0xff]   ;;  %v2300_v3 = vld [vmem:[#allocation2 + $0x8] ss:$16 sps:$4 sm:$0xff]   ;;  %1444 = vmatprep.subr.bf16.mxu1 %v2297_v1  ;;  %v2301_v4 = vld [vmem:[#allocation2 + $0x24] ss:$16 sps:$4 sm:$0xff]  }
  0x28   :  { %1273 = vmatpush1.bf16.msra.mxu0 %v2299_v2  ;;  %1445 = vmatpush1.bf16.msra.mxu1 %v2300_v3  ;;  %v2303_v5 = vld [vmem:[#allocation2 + $0x2c] ss:$16 sps:$4 sm:$0xff]   ;;  %v2305_v6 = vld [vmem:[#allocation2 + $0x20] ss:$16 sps:$4 sm:$0xff]   ;;  %v2306_v7 = vld [vmem:[#allocation2 + $0x28] ss:$16 sps:$4 sm:$0xff]  }
  0x29   :  { %1274 = vmatprep.subr.bf16.mxu0 %v2301_v4  ;;  %1446 = vmatprep.subr.bf16.mxu1 %v2303_v5  ;;  %v2307_v8 = vld [vmem:[#allocation2 + $0x44] ss:$16 sps:$4 sm:$0xff]   ;;  %v2309_v9 = vld [vmem:[#allocation2 + $0x4c] ss:$16 sps:$4 sm:$0xff]   ;;  %v2311_v10 = vld [vmem:[#allocation2 + $0x40] ss:$16 sps:$4 sm:$0xff]  }
  0x2a   :  { %v2312_v11 = vld [vmem:[#allocation2 + $0x48] ss:$16 sps:$4 sm:$0xff]   ;;  %v2313_v12 = vld [vmem:[#allocation2 + $0x64] ss:$16 sps:$4 sm:$0xff]   ;;  %v2315_v13 = vld [vmem:[#allocation2 + $0x6c] ss:$16 sps:$4 sm:$0xff]  }
  0x2b   :  { %v2317_v14 = vld [vmem:[#allocation2 + $0x60] ss:$16 sps:$4 sm:$0xff]   ;;  %v2318_v15 = vld [vmem:[#allocation2 + $0x68] ss:$16 sps:$4 sm:$0xff]   ;;  %v2319_v16 = vld [vmem:[#allocation2 + $0x84] ss:$16 sps:$4 sm:$0xff]  }
  0x2c   :  { %1275 = vmatpush1.bf16.msra.mxu0 %v2305_v6  ;;  %1447 = vmatpush1.bf16.msra.mxu1 %v2306_v7  ;;  %v2321_v17 = vld [vmem:[#allocation2 + $0x8c] ss:$16 sps:$4 sm:$0xff]   ;;  %v2323_v18 = vld [vmem:[#allocation2 + $0x80] ss:$16 sps:$4 sm:$0xff]   ;;  %v2324_v19 = vld [vmem:[#allocation2 + $0x88] ss:$16 sps:$4 sm:$0xff]  }
  0x2d   :  { %1276 = vmatprep.subr.bf16.mxu0 %v2307_v8  ;;  %1448 = vmatprep.subr.bf16.mxu1 %v2309_v9  ;;  %v2325_v20 = vld [vmem:[#allocation2 + $0xa4] ss:$16 sps:$4 sm:$0xff]   ;;  %v2327_v21 = vld [vmem:[#allocation2 + $0xac] ss:$16 sps:$4 sm:$0xff]   ;;  %v2329_v22 = vld [vmem:[#allocation2 + $0xa0] ss:$16 sps:$4 sm:$0xff]  }
  0x2e   :  { %v2330_v23 = vld [vmem:[#allocation2 + $0xa8] ss:$16 sps:$4 sm:$0xff]   ;;  %v2331_v24 = vld [vmem:[#allocation2 + $0xc4] ss:$16 sps:$4 sm:$0xff]   ;;  %v2333_v25 = vld [vmem:[#allocation2 + $0xcc] ss:$16 sps:$4 sm:$0xff]  }
  0x2f   :  { %v2335_v26 = vld [vmem:[#allocation2 + $0xc0] ss:$16 sps:$4 sm:$0xff]   ;;  %v2336_v27 = vld [vmem:[#allocation2 + $0xc8] ss:$16 sps:$4 sm:$0xff]   ;;  %v2337_v28 = vld [vmem:[#allocation2 + $0xe4] ss:$16 sps:$4 sm:$0xff]  }
  0x30   :  { %1277 = vmatpush1.bf16.msra.mxu0 %v2311_v10  ;;  %1449 = vmatpush1.bf16.msra.mxu1 %v2312_v11  ;;  %v2339_v29 = vld [vmem:[#allocation2 + $0xec] ss:$16 sps:$4 sm:$0xff]   ;;  %v2341_v30 = vld [vmem:[#allocation2 + $0xe0] ss:$16 sps:$4 sm:$0xff]   ;;  %v2342_v31 = vld [vmem:[#allocation2 + $0xe8] ss:$16 sps:$4 sm:$0xff]  }
  0x31   :  { %1278 = vmatprep.subr.bf16.mxu0 %v2313_v12  ;;  %1450 = vmatprep.subr.bf16.mxu1 %v2315_v13  ;;  %v2343_v32 = vld [vmem:[#allocation2 + $0x104] ss:$16 sps:$4 sm:$0xff]   ;;  %v2345_v33 = vld [vmem:[#allocation2 + $0x10c] ss:$16 sps:$4 sm:$0xff]   ;;  %v2347_v34 = vld [vmem:[#allocation2 + $0x100] ss:$16 sps:$4 sm:$0xff]  }
  0x32   :  { %v2348_v35 = vld [vmem:[#allocation2 + $0x108] ss:$16 sps:$4 sm:$0xff]   ;;  %v2349_v36 = vld [vmem:[#allocation2 + $0x124] ss:$16 sps:$4 sm:$0xff]   ;;  %v2351_v37 = vld [vmem:[#allocation2 + $0x12c] ss:$16 sps:$4 sm:$0xff]  }
  0x33   :  { %v2353_v38 = vld [vmem:[#allocation2 + $0x120] ss:$16 sps:$4 sm:$0xff]   ;;  %v2354_v39 = vld [vmem:[#allocation2 + $0x128] ss:$16 sps:$4 sm:$0xff]   ;;  %v2355_v40 = vld [vmem:[#allocation2 + $0x144] ss:$16 sps:$4 sm:$0xff]  }
  0x34   :  { %1279 = vmatpush1.bf16.msra.mxu0 %v2317_v14  ;;  %1451 = vmatpush1.bf16.msra.mxu1 %v2318_v15  ;;  %v2357_v41 = vld [vmem:[#allocation2 + $0x14c] ss:$16 sps:$4 sm:$0xff]   ;;  %v2359_v42 = vld [vmem:[#allocation2 + $0x140] ss:$16 sps:$4 sm:$0xff]   ;;  %v2360_v43 = vld [vmem:[#allocation2 + $0x148] ss:$16 sps:$4 sm:$0xff]  }
  0x35   :  { %1280 = vmatprep.subr.bf16.mxu0 %v2319_v16  ;;  %1452 = vmatprep.subr.bf16.mxu1 %v2321_v17  ;;  %v2361_v44 = vld [vmem:[#allocation2 + $0x164] ss:$16 sps:$4 sm:$0xff]   ;;  %v2363_v45 = vld [vmem:[#allocation2 + $0x16c] ss:$16 sps:$4 sm:$0xff]   ;;  %v2365_v48 = vld [vmem:[#allocation2 + $0x160] ss:$16 sps:$4 sm:$0xff]  }
  0x36   :  { %v50_v46 = vld [vmem:[%s2784_s0 + $0x8] sm:$0xff]  ;;  %v57_v47 = vld [vmem:[%s2784_s0 + $0x40] sm:$0xff]  ;;  %v56_v5 = vld [vmem:[%s2784_s0 + $0x38] sm:$0xff]  ;;  %vm1268_vm0 = vcmask 130048  }
  0x37   :  { %v2366_v49 = vld [vmem:[#allocation2 + $0x168] ss:$16 sps:$4 sm:$0xff]   ;;  %v64_v50 = vpack.c.bf16 %v57_v47, %v50_v46  ;;  %v2367_v51 = vld [vmem:[#allocation2 + $0x184] ss:$16 sps:$4 sm:$0xff]   ;;  %v2369_v52 = vld [vmem:[#allocation2 + $0x18c] ss:$16 sps:$4 sm:$0xff]  }
  0x38   :  { %1281 = vmatpush1.bf16.msra.mxu0 %v2323_v18  ;;  %1453 = vmatpush1.bf16.msra.mxu1 %v2324_v19  ;;  %v2371_v53 = vld [vmem:[#allocation2 + $0x180] ss:$16 sps:$4 sm:$0xff]   ;;  %v2372_v54 = vld [vmem:[#allocation2 + $0x188] ss:$16 sps:$4 sm:$0xff]   ;;  %v2373_v55 = vld [vmem:[#allocation2 + $0x1a4] ss:$16 sps:$4 sm:$0xff]  }
  0x39   :  { %1282 = vmatprep.subr.bf16.mxu0 %v2325_v20  ;;  %1454 = vmatprep.subr.bf16.mxu1 %v2327_v21  ;;  %v2375_v56 = vld [vmem:[#allocation2 + $0x1ac] ss:$16 sps:$4 sm:$0xff]   ;;  %v2377_v57 = vld [vmem:[#allocation2 + $0x1a0] ss:$16 sps:$4 sm:$0xff]   ;;  %v2378_v58 = vld [vmem:[#allocation2 + $0x1a8] ss:$16 sps:$4 sm:$0xff]  }
  0x3a   :  { %1304 = vmatprep.mubr.bf16.mxu0 %v64_v50  ;;  %1476 = vmatprep.mubr.bf16.mxu1 %v64_v50  ;;  %v2379_v59 = vld [vmem:[#allocation2 + $0x1c4] ss:$16 sps:$4 sm:$0xff]   ;;  %v2381_v60 = vld [vmem:[#allocation2 + $0x1cc] ss:$16 sps:$4 sm:$0xff]   ;;  %v2383_v61 = vld [vmem:[#allocation2 + $0x1c0] ss:$16 sps:$4 sm:$0xff]  }
  0x3b   :  { %v2384_v62 = vld [vmem:[#allocation2 + $0x1c8] ss:$16 sps:$4 sm:$0xff]   ;;  %v2385_v63 = vld [vmem:[#allocation2 + $0x1e4] ss:$16 sps:$4 sm:$0xff]   ;;  %v2387_v0 = vld [vmem:[#allocation2 + $0x1ec] ss:$16 sps:$4 sm:$0xff]  }
  0x3c   :  { %1283 = vmatpush1.bf16.msra.mxu0 %v2329_v22  ;;  %1455 = vmatpush1.bf16.msra.mxu1 %v2330_v23  ;;  %v2389_v1 = vld [vmem:[#allocation2 + $0x1e0] ss:$16 sps:$4 sm:$0xff]   ;;  %v2390_v2 = vld [vmem:[#allocation2 + $0x1e8] ss:$16 sps:$4 sm:$0xff]   ;;  %v2393_v3 = vld [vmem:[#allocation2 + $0x204] ss:$16 sps:$4 sm:$0xff]  }
  0x3d   :  { %1284 = vmatprep.subr.bf16.mxu0 %v2331_v24  ;;  %1456 = vmatprep.subr.bf16.mxu1 %v2333_v25  ;;  %v49_v4 = vld [vmem:[%s2784_s0] sm:$0xff]  ;;  %v2396_v6 = vld [vmem:[#allocation2 + $0x20c] ss:$16 sps:$4 sm:$0xff]   ;;  %v2394_v8 = vld [vmem:[#allocation2 + $0x208] ss:$16 sps:$4 sm:$0xff]  }
  0x3e   :  { %v2391_v7 = vld [vmem:[#allocation2 + $0x200] ss:$16 sps:$4 sm:$0xff]   ;;  %v63_v9 = vpack.c.bf16 %v56_v5, %v49_v4  ;;  %v2399_v10 = vld [vmem:[#allocation2 + $0x224] ss:$16 sps:$4 sm:$0xff]   ;;  %v2402_v11 = vld [vmem:[#allocation2 + $0x22c] ss:$16 sps:$4 sm:$0xff]  }
  0x3f   :  { %v2397_v12 = vld [vmem:[#allocation2 + $0x220] ss:$16 sps:$4 sm:$0xff]   ;;  %v2400_v13 = vld [vmem:[#allocation2 + $0x228] ss:$16 sps:$4 sm:$0xff]   ;;  %v2405_v14 = vld [vmem:[#allocation2 + $0x244] ss:$16 sps:$4 sm:$0xff]  }
  0x40   :  { %1285 = vmatpush1.bf16.msra.mxu0 %v2335_v26  ;;  %1457 = vmatpush1.bf16.msra.mxu1 %v2336_v27  ;;  %v2408_v15 = vld [vmem:[#allocation2 + $0x24c] ss:$16 sps:$4 sm:$0xff]   ;;  %v2403_v16 = vld [vmem:[#allocation2 + $0x240] ss:$16 sps:$4 sm:$0xff]   ;;  %v2406_v17 = vld [vmem:[#allocation2 + $0x248] ss:$16 sps:$4 sm:$0xff]  }
  0x41   :  { %1286 = vmatprep.subr.bf16.mxu0 %v2337_v28  ;;  %1458 = vmatprep.subr.bf16.mxu1 %v2339_v29  ;;  %v2411_v18 = vld [vmem:[#allocation2 + $0x264] ss:$16 sps:$4 sm:$0xff]   ;;  %v2414_v19 = vld [vmem:[#allocation2 + $0x26c] ss:$16 sps:$4 sm:$0xff]   ;;  %v2409_v20 = vld [vmem:[#allocation2 + $0x260] ss:$16 sps:$4 sm:$0xff]  }
  0x42   :  { %v2412_v21 = vld [vmem:[#allocation2 + $0x268] ss:$16 sps:$4 sm:$0xff]   ;;  %v2417_v22 = vld [vmem:[#allocation2 + $0x284] ss:$16 sps:$4 sm:$0xff]   ;;  %v2420_v23 = vld [vmem:[#allocation2 + $0x28c] ss:$16 sps:$4 sm:$0xff]  }
  0x43   :  { %v2415_v24 = vld [vmem:[#allocation2 + $0x280] ss:$16 sps:$4 sm:$0xff]   ;;  %v2418_v25 = vld [vmem:[#allocation2 + $0x288] ss:$16 sps:$4 sm:$0xff]   ;;  %v2423_v26 = vld [vmem:[#allocation2 + $0x2a4] ss:$16 sps:$4 sm:$0xff]  }
  0x44   :  { %1287 = vmatpush1.bf16.msra.mxu0 %v2341_v30  ;;  %1459 = vmatpush1.bf16.msra.mxu1 %v2342_v31  ;;  %v2426_v27 = vld [vmem:[#allocation2 + $0x2ac] ss:$16 sps:$4 sm:$0xff]   ;;  %v2421_v28 = vld [vmem:[#allocation2 + $0x2a0] ss:$16 sps:$4 sm:$0xff]   ;;  %v2424_v29 = vld [vmem:[#allocation2 + $0x2a8] ss:$16 sps:$4 sm:$0xff]  }
  0x45   :  { %1288 = vmatprep.subr.bf16.mxu0 %v2343_v32  ;;  %1460 = vmatprep.subr.bf16.mxu1 %v2345_v33  ;;  %v2429_v30 = vld [vmem:[#allocation2 + $0x2c4] ss:$16 sps:$4 sm:$0xff]   ;;  %v2432_v31 = vld [vmem:[#allocation2 + $0x2cc] ss:$16 sps:$4 sm:$0xff]   ;;  %v2445_v47 = vld [vmem:[#allocation2 + $0x320] ss:$16 sps:$4 sm:$0xff]  }
  0x46   :  { %v52_v32 = vld [vmem:[%s2784_s0 + $0x18] sm:$0xff]  ;;  %v59_v33 = vld [vmem:[%s2784_s0 + $0x50] sm:$0xff] }
  0x47   :  { %v2450_v46 = vld [vmem:[#allocation2 + $0x32c] ss:$16 sps:$4 sm:$0xff]   ;;  %v2478_v4 = vld [vmem:[#allocation2 + $0x3c8] ss:$16 sps:$4 sm:$0xff]   ;;  %v2483_v5 = vld [vmem:[#allocation2 + $0x3e4] ss:$16 sps:$4 sm:$0xff]  }
  0x48   :  { %1289 = vmatpush1.bf16.msra.mxu0 %v2347_v34  ;;  %1461 = vmatpush1.bf16.msra.mxu1 %v2348_v35  ;;  %v2427_v34 = vld [vmem:[#allocation2 + $0x2c0] ss:$16 sps:$4 sm:$0xff]   ;;  %v2430_v35 = vld [vmem:[#allocation2 + $0x2c8] ss:$16 sps:$4 sm:$0xff]   ;;  %v2456_v50 = vld [vmem:[#allocation2 + $0x34c] ss:$16 sps:$4 sm:$0xff]  }
  0x49   :  { %1290 = vmatprep.subr.bf16.mxu0 %v2349_v36  ;;  %1462 = vmatprep.subr.bf16.mxu1 %v2351_v37  ;;  %v66_v36 = vpack.c.bf16 %v59_v33, %v52_v32  ;;  %v2435_v37 = vld [vmem:[#allocation2 + $0x2e4] ss:$16 sps:$4 sm:$0xff]   ;;  %v2516_v32 = vld [vmem:[#allocation2 + $0x48c] ss:$16 sps:$4 sm:$0xff]   ;;  %v2511_v33 = vld [vmem:[#allocation2 + $0x480] ss:$16 sps:$4 sm:$0xff]  }
  0x4c   :  { %1291 = vmatpush1.bf16.msra.mxu0 %v2353_v38  ;;  %1463 = vmatpush1.bf16.msra.mxu1 %v2354_v39  ;;  %v2438_v38 = vld [vmem:[#allocation2 + $0x2ec] ss:$16 sps:$4 sm:$0xff]   ;;  %v2433_v39 = vld [vmem:[#allocation2 + $0x2e0] ss:$16 sps:$4 sm:$0xff]  }
  0x4d   :  { %1292 = vmatprep.subr.bf16.mxu0 %v2355_v40  ;;  %1464 = vmatprep.subr.bf16.mxu1 %v2357_v41  ;;  %v2436_v40 = vld [vmem:[#allocation2 + $0x2e8] ss:$16 sps:$4 sm:$0xff]   ;;  %v2441_v41 = vld [vmem:[#allocation2 + $0x304] ss:$16 sps:$4 sm:$0xff]  }
  0x50   :  { %1293 = vmatpush1.bf16.msra.mxu0 %v2359_v42  ;;  %1465 = vmatpush1.bf16.msra.mxu1 %v2360_v43  ;;  %v2444_v42 = vld [vmem:[#allocation2 + $0x30c] ss:$16 sps:$4 sm:$0xff]   ;;  %v2439_v43 = vld [vmem:[#allocation2 + $0x300] ss:$16 sps:$4 sm:$0xff]  }
  0x51   :  { %1294 = vmatprep.subr.bf16.mxu0 %v2361_v44  ;;  %1466 = vmatprep.subr.bf16.mxu1 %v2363_v45  ;;  %v2442_v44 = vld [vmem:[#allocation2 + $0x308] ss:$16 sps:$4 sm:$0xff]   ;;  %v2447_v45 = vld [vmem:[#allocation2 + $0x324] ss:$16 sps:$4 sm:$0xff]  }
  0x54   :  { %1295 = vmatpush1.bf16.msra.mxu0 %v2365_v48  ;;  %1467 = vmatpush1.bf16.msra.mxu1 %v2366_v49  ;;  %v2448_v48 = vld [vmem:[#allocation2 + $0x328] ss:$16 sps:$4 sm:$0xff]   ;;  %v2453_v49 = vld [vmem:[#allocation2 + $0x344] ss:$16 sps:$4 sm:$0xff]  }
  0x55   :  { %1296 = vmatprep.subr.bf16.mxu0 %v2367_v51  ;;  %1468 = vmatprep.subr.bf16.mxu1 %v2369_v52  ;;  %v2451_v51 = vld [vmem:[#allocation2 + $0x340] ss:$16 sps:$4 sm:$0xff]   ;;  %v2454_v52 = vld [vmem:[#allocation2 + $0x348] ss:$16 sps:$4 sm:$0xff]  }
  0x58   :  { %1297 = vmatpush1.bf16.msra.mxu0 %v2371_v53  ;;  %1469 = vmatpush1.bf16.msra.mxu1 %v2372_v54  ;;  %v2459_v53 = vld [vmem:[#allocation2 + $0x364] ss:$16 sps:$4 sm:$0xff]   ;;  %v2462_v54 = vld [vmem:[#allocation2 + $0x36c] ss:$16 sps:$4 sm:$0xff]  }
  0x59   :  { %1298 = vmatprep.subr.bf16.mxu0 %v2373_v55  ;;  %1470 = vmatprep.subr.bf16.mxu1 %v2375_v56  ;;  %v2457_v55 = vld [vmem:[#allocation2 + $0x360] ss:$16 sps:$4 sm:$0xff]   ;;  %v2460_v56 = vld [vmem:[#allocation2 + $0x368] ss:$16 sps:$4 sm:$0xff]  }
  0x5c   :  { %1299 = vmatpush1.bf16.msra.mxu0 %v2377_v57  ;;  %1471 = vmatpush1.bf16.msra.mxu1 %v2378_v58  ;;  %v2465_v57 = vld [vmem:[#allocation2 + $0x384] ss:$16 sps:$4 sm:$0xff]   ;;  %v2468_v58 = vld [vmem:[#allocation2 + $0x38c] ss:$16 sps:$4 sm:$0xff]  }
  0x5d   :  { %1300 = vmatprep.subr.bf16.mxu0 %v2379_v59  ;;  %1472 = vmatprep.subr.bf16.mxu1 %v2381_v60  ;;  %v2463_v59 = vld [vmem:[#allocation2 + $0x380] ss:$16 sps:$4 sm:$0xff]   ;;  %v2466_v60 = vld [vmem:[#allocation2 + $0x388] ss:$16 sps:$4 sm:$0xff]  }
  0x60   :  { %1301 = vmatpush1.bf16.msra.mxu0 %v2383_v61  ;;  %1473 = vmatpush1.bf16.msra.mxu1 %v2384_v62  ;;  %v2471_v61 = vld [vmem:[#allocation2 + $0x3a4] ss:$16 sps:$4 sm:$0xff]   ;;  %v2474_v62 = vld [vmem:[#allocation2 + $0x3ac] ss:$16 sps:$4 sm:$0xff]  }
  0x61   :  { %1302 = vmatprep.subr.bf16.mxu0 %v2385_v63  ;;  %1474 = vmatprep.subr.bf16.mxu1 %v2387_v0  ;;  %v2469_v63 = vld [vmem:[#allocation2 + $0x3a0] ss:$16 sps:$4 sm:$0xff]   ;;  %v2472_v0 = vld [vmem:[#allocation2 + $0x3a8] ss:$16 sps:$4 sm:$0xff]  }
  0x64   :  { %1303 = vmatpush1.bf16.msra.mxu0 %v2389_v1  ;;  %1475 = vmatpush1.bf16.msra.mxu1 %v2390_v2  ;;  %v2477_v1 = vld [vmem:[#allocation2 + $0x3c4] ss:$16 sps:$4 sm:$0xff]   ;;  %v2480_v2 = vld [vmem:[#allocation2 + $0x3cc] ss:$16 sps:$4 sm:$0xff]  }
  0x65   :  { %1315 = vmatprep.subr.bf16.mxu0 %v2393_v3  ;;  %1487 = vmatprep.subr.bf16.mxu1 %v2396_v6  ;;  %v2475_v3 = vld [vmem:[#allocation2 + $0x3c0] ss:$16 sps:$4 sm:$0xff]   ;;  %v2486_v6 = vld [vmem:[#allocation2 + $0x3ec] ss:$16 sps:$4 sm:$0xff]  }
  0x67   :  { %1305 = vmatmul.mubr.bf16.vlgmr.msra.gmra.mrb[0].mxu0 %v63_v9  ;;  %1477 = vmatmul.mubr.bf16.vlgmr.msra.gmra.mrb[0].mxu1 %v63_v9  ;;  %v2489_v9 = vld [vmem:[#allocation2 + $0x404] ss:$16 sps:$4 sm:$0xff]  }
  0x68   :  { %1316 = vmatpush1.bf16.msra.mxu0 %v2391_v7  ;;  %1488 = vmatpush1.bf16.msra.mxu1 %v2394_v8  ;;  %v2481_v7 = vld [vmem:[#allocation2 + $0x3e0] ss:$16 sps:$4 sm:$0xff]   ;;  %v2484_v8 = vld [vmem:[#allocation2 + $0x3e8] ss:$16 sps:$4 sm:$0xff]  }
  0x69   :  { %1317 = vmatprep.subr.bf16.mxu0 %v2399_v10  ;;  %1489 = vmatprep.subr.bf16.mxu1 %v2402_v11  ;;  %v51_v10 = vld [vmem:[%s2784_s0 + $0x10] sm:$0xff]  ;;  %v58_v11 = vld [vmem:[%s2784_s0 + $0x48] sm:$0xff] }
  0x6a   :  { %1347 = vmatprep.mubr.bf16.mxu0 %v66_v36  ;;  %1519 = vmatprep.mubr.bf16.mxu1 %v66_v36  ;;  %v2522_v36 = vld [vmem:[#allocation2 + $0x4ac] ss:$16 sps:$4 sm:$0xff]  }
  0x6c   :  { %1318 = vmatpush1.bf16.msra.mxu0 %v2397_v12  ;;  %1490 = vmatpush1.bf16.msra.mxu1 %v2400_v13  ;;  %v2492_v12 = vld [vmem:[#allocation2 + $0x40c] ss:$16 sps:$4 sm:$0xff]   ;;  %v2487_v13 = vld [vmem:[#allocation2 + $0x400] ss:$16 sps:$4 sm:$0xff]  }
  0x6d   :  { %1319 = vmatprep.subr.bf16.mxu0 %v2405_v14  ;;  %1491 = vmatprep.subr.bf16.mxu1 %v2408_v15  ;;  %v2490_v14 = vld [vmem:[#allocation2 + $0x408] ss:$16 sps:$4 sm:$0xff]   ;;  %v65_v15 = vpack.c.bf16 %v58_v11, %v51_v10  ;;  %v2579_v11 = vld [vmem:[#allocation2 + $0x5e4] ss:$16 sps:$4 sm:$0xff]  }
  0x6e   :  { %v2574_v10 = vld [vmem:[#allocation2 + $0x5c8] ss:$16 sps:$4 sm:$0xff]  }
  0x70   :  { %1320 = vmatpush1.bf16.msra.mxu0 %v2403_v16  ;;  %1492 = vmatpush1.bf16.msra.mxu1 %v2406_v17  ;;  %v2495_v16 = vld [vmem:[#allocation2 + $0x424] ss:$16 sps:$4 sm:$0xff]   ;;  %v2498_v17 = vld [vmem:[#allocation2 + $0x42c] ss:$16 sps:$4 sm:$0xff]  }
  0x71   :  { %1321 = vmatprep.subr.bf16.mxu0 %v2411_v18  ;;  %1493 = vmatprep.subr.bf16.mxu1 %v2414_v19  ;;  %v54_v18 = vld [vmem:[%s2784_s0 + $0x28] sm:$0xff]  ;;  %v2493_v19 = vld [vmem:[#allocation2 + $0x420] ss:$16 sps:$4 sm:$0xff]  }
  0x74   :  { %1322 = vmatpush1.bf16.msra.mxu0 %v2409_v20  ;;  %1494 = vmatpush1.bf16.msra.mxu1 %v2412_v21  ;;  %v2496_v20 = vld [vmem:[#allocation2 + $0x428] ss:$16 sps:$4 sm:$0xff]   ;;  %v61_v21 = vld [vmem:[%s2784_s0 + $0x60] sm:$0xff] }
  0x75   :  { %1323 = vmatprep.subr.bf16.mxu0 %v2417_v22  ;;  %1495 = vmatprep.subr.bf16.mxu1 %v2420_v23  ;;  %v2501_v22 = vld [vmem:[#allocation2 + $0x444] ss:$16 sps:$4 sm:$0xff]   ;;  %v68_v23 = vpack.c.bf16 %v61_v21, %v54_v18  ;;  %v2588_v18 = vld [vmem:[#allocation2 + $0x60c] ss:$16 sps:$4 sm:$0xff]   ;;  %v2586_v21 = vld [vmem:[#allocation2 + $0x608] ss:$16 sps:$4 sm:$0xff]  }
  0x78   :  { %1324 = vmatpush1.bf16.msra.mxu0 %v2415_v24  ;;  %1496 = vmatpush1.bf16.msra.mxu1 %v2418_v25  ;;  %v2504_v24 = vld [vmem:[#allocation2 + $0x44c] ss:$16 sps:$4 sm:$0xff]   ;;  %v2499_v25 = vld [vmem:[#allocation2 + $0x440] ss:$16 sps:$4 sm:$0xff]  }
  0x79   :  { %1325 = vmatprep.subr.bf16.mxu0 %v2423_v26  ;;  %1497 = vmatprep.subr.bf16.mxu1 %v2426_v27  ;;  %v2502_v26 = vld [vmem:[#allocation2 + $0x448] ss:$16 sps:$4 sm:$0xff]   ;;  %v2507_v27 = vld [vmem:[#allocation2 + $0x464] ss:$16 sps:$4 sm:$0xff]  }
  0x7c   :  { %1326 = vmatpush1.bf16.msra.mxu0 %v2421_v28  ;;  %1498 = vmatpush1.bf16.msra.mxu1 %v2424_v29  ;;  %v2510_v28 = vld [vmem:[#allocation2 + $0x46c] ss:$16 sps:$4 sm:$0xff]   ;;  %v2505_v29 = vld [vmem:[#allocation2 + $0x460] ss:$16 sps:$4 sm:$0xff]  }
  0x7d   :  { %1327 = vmatprep.subr.bf16.mxu0 %v2429_v30  ;;  %1499 = vmatprep.subr.bf16.mxu1 %v2432_v31  ;;  %v2508_v30 = vld [vmem:[#allocation2 + $0x468] ss:$16 sps:$4 sm:$0xff]   ;;  %v2513_v31 = vld [vmem:[#allocation2 + $0x484] ss:$16 sps:$4 sm:$0xff]  }
  0x80   :  { %1328 = vmatpush1.bf16.msra.mxu0 %v2427_v34  ;;  %1500 = vmatpush1.bf16.msra.mxu1 %v2430_v35  ;;  %v2514_v34 = vld [vmem:[#allocation2 + $0x488] ss:$16 sps:$4 sm:$0xff]   ;;  %v2519_v35 = vld [vmem:[#allocation2 + $0x4a4] ss:$16 sps:$4 sm:$0xff]  }
  0x81   :  { %1329 = vmatprep.subr.bf16.mxu0 %v2435_v37  ;;  %1501 = vmatprep.subr.bf16.mxu1 %v2438_v38  ;;  %v2517_v37 = vld [vmem:[#allocation2 + $0x4a0] ss:$16 sps:$4 sm:$0xff]   ;;  %v2520_v38 = vld [vmem:[#allocation2 + $0x4a8] ss:$16 sps:$4 sm:$0xff]  }
  0x84   :  { %1330 = vmatpush1.bf16.msra.mxu0 %v2433_v39  ;;  %1502 = vmatpush1.bf16.msra.mxu1 %v2436_v40  ;;  %v2525_v39 = vld [vmem:[#allocation2 + $0x4c4] ss:$16 sps:$4 sm:$0xff]   ;;  %v2528_v40 = vld [vmem:[#allocation2 + $0x4cc] ss:$16 sps:$4 sm:$0xff]  }
  0x85   :  { %1331 = vmatprep.subr.bf16.mxu0 %v2441_v41  ;;  %1503 = vmatprep.subr.bf16.mxu1 %v2444_v42  ;;  %v2523_v41 = vld [vmem:[#allocation2 + $0x4c0] ss:$16 sps:$4 sm:$0xff]   ;;  %v2526_v42 = vld [vmem:[#allocation2 + $0x4c8] ss:$16 sps:$4 sm:$0xff]  }
  0x88   :  { %1332 = vmatpush1.bf16.msra.mxu0 %v2439_v43  ;;  %1504 = vmatpush1.bf16.msra.mxu1 %v2442_v44  ;;  %v2531_v43 = vld [vmem:[#allocation2 + $0x4e4] ss:$16 sps:$4 sm:$0xff]   ;;  %v2534_v44 = vld [vmem:[#allocation2 + $0x4ec] ss:$16 sps:$4 sm:$0xff]  }
  0x89   :  { %1333 = vmatprep.subr.bf16.mxu0 %v2447_v45  ;;  %1505 = vmatprep.subr.bf16.mxu1 %v2450_v46  ;;  %v2529_v45 = vld [vmem:[#allocation2 + $0x4e0] ss:$16 sps:$4 sm:$0xff]   ;;  %v2532_v46 = vld [vmem:[#allocation2 + $0x4e8] ss:$16 sps:$4 sm:$0xff]  }
  0x8c   :  { %1334 = vmatpush1.bf16.msra.mxu0 %v2445_v47  ;;  %1506 = vmatpush1.bf16.msra.mxu1 %v2448_v48  ;;  %v2537_v47 = vld [vmem:[#allocation2 + $0x504] ss:$16 sps:$4 sm:$0xff]   ;;  %v2540_v48 = vld [vmem:[#allocation2 + $0x50c] ss:$16 sps:$4 sm:$0xff]  }
  0x8d   :  { %1335 = vmatprep.subr.bf16.mxu0 %v2453_v49  ;;  %1507 = vmatprep.subr.bf16.mxu1 %v2456_v50  ;;  %v2535_v49 = vld [vmem:[#allocation2 + $0x500] ss:$16 sps:$4 sm:$0xff]   ;;  %v2538_v50 = vld [vmem:[#allocation2 + $0x508] ss:$16 sps:$4 sm:$0xff]  }
  0x90   :  { %1336 = vmatpush1.bf16.msra.mxu0 %v2451_v51  ;;  %1508 = vmatpush1.bf16.msra.mxu1 %v2454_v52  ;;  %v2543_v51 = vld [vmem:[#allocation2 + $0x524] ss:$16 sps:$4 sm:$0xff]   ;;  %v2546_v52 = vld [vmem:[#allocation2 + $0x52c] ss:$16 sps:$4 sm:$0xff]  }
  0x91   :  { %1337 = vmatprep.subr.bf16.mxu0 %v2459_v53  ;;  %1509 = vmatprep.subr.bf16.mxu1 %v2462_v54  ;;  %v2541_v53 = vld [vmem:[#allocation2 + $0x520] ss:$16 sps:$4 sm:$0xff]   ;;  %v2544_v54 = vld [vmem:[#allocation2 + $0x528] ss:$16 sps:$4 sm:$0xff]  }
  0x94   :  { %1338 = vmatpush1.bf16.msra.mxu0 %v2457_v55  ;;  %1510 = vmatpush1.bf16.msra.mxu1 %v2460_v56  ;;  %v2549_v55 = vld [vmem:[#allocation2 + $0x544] ss:$16 sps:$4 sm:$0xff]   ;;  %v2552_v56 = vld [vmem:[#allocation2 + $0x54c] ss:$16 sps:$4 sm:$0xff]  }
  0x95   :  { %1339 = vmatprep.subr.bf16.mxu0 %v2465_v57  ;;  %1511 = vmatprep.subr.bf16.mxu1 %v2468_v58  ;;  %v2547_v57 = vld [vmem:[#allocation2 + $0x540] ss:$16 sps:$4 sm:$0xff]   ;;  %v2550_v58 = vld [vmem:[#allocation2 + $0x548] ss:$16 sps:$4 sm:$0xff]  }
  0x98   :  { %1340 = vmatpush1.bf16.msra.mxu0 %v2463_v59  ;;  %1512 = vmatpush1.bf16.msra.mxu1 %v2466_v60  ;;  %v2555_v59 = vld [vmem:[#allocation2 + $0x564] ss:$16 sps:$4 sm:$0xff]   ;;  %v2558_v60 = vld [vmem:[#allocation2 + $0x56c] ss:$16 sps:$4 sm:$0xff]  }
  0x99   :  { %1341 = vmatprep.subr.bf16.mxu0 %v2471_v61  ;;  %1513 = vmatprep.subr.bf16.mxu1 %v2474_v62  ;;  %v2553_v61 = vld [vmem:[#allocation2 + $0x560] ss:$16 sps:$4 sm:$0xff]   ;;  %v2556_v62 = vld [vmem:[#allocation2 + $0x568] ss:$16 sps:$4 sm:$0xff]  }
  0x9c   :  { %1342 = vmatpush1.bf16.msra.mxu0 %v2469_v63  ;;  %1514 = vmatpush1.bf16.msra.mxu1 %v2472_v0  ;;  %v2561_v63 = vld [vmem:[#allocation2 + $0x584] ss:$16 sps:$4 sm:$0xff]   ;;  %v2564_v0 = vld [vmem:[#allocation2 + $0x58c] ss:$16 sps:$4 sm:$0xff]  }
  0x9d   :  { %1343 = vmatprep.subr.bf16.mxu0 %v2477_v1  ;;  %1515 = vmatprep.subr.bf16.mxu1 %v2480_v2  ;;  %v2559_v1 = vld [vmem:[#allocation2 + $0x580] ss:$16 sps:$4 sm:$0xff]   ;;  %v2562_v2 = vld [vmem:[#allocation2 + $0x588] ss:$16 sps:$4 sm:$0xff]  }
  0xa0   :  { %1344 = vmatpush1.bf16.msra.mxu0 %v2475_v3  ;;  %1516 = vmatpush1.bf16.msra.mxu1 %v2478_v4  ;;  %v2567_v3 = vld [vmem:[#allocation2 + $0x5a4] ss:$16 sps:$4 sm:$0xff]   ;;  %v2570_v4 = vld [vmem:[#allocation2 + $0x5ac] ss:$16 sps:$4 sm:$0xff]  }
  0xa1   :  { %1345 = vmatprep.subr.bf16.mxu0 %v2483_v5  ;;  %1517 = vmatprep.subr.bf16.mxu1 %v2486_v6  ;;  %v2565_v5 = vld [vmem:[#allocation2 + $0x5a0] ss:$16 sps:$4 sm:$0xff]   ;;  %v2568_v6 = vld [vmem:[#allocation2 + $0x5a8] ss:$16 sps:$4 sm:$0xff]  }
  0xa4   :  { %1346 = vmatpush1.bf16.msra.mxu0 %v2481_v7  ;;  %1518 = vmatpush1.bf16.msra.mxu1 %v2484_v8  ;;  %v2573_v7 = vld [vmem:[#allocation2 + $0x5c4] ss:$16 sps:$4 sm:$0xff]   ;;  %v2576_v8 = vld [vmem:[#allocation2 + $0x5cc] ss:$16 sps:$4 sm:$0xff]  }
  0xa5   :  { %1358 = vmatprep.subr.bf16.mxu0 %v2489_v9  ;;  %1530 = vmatprep.subr.bf16.mxu1 %v2492_v12  ;;  %v2571_v9 = vld [vmem:[#allocation2 + $0x5c0] ss:$16 sps:$4 sm:$0xff]   ;;  %v2582_v12 = vld [vmem:[#allocation2 + $0x5ec] ss:$16 sps:$4 sm:$0xff]  }
  0xa7   :  { %1348 = vmatmul.mubr.bf16.vlgmr.msra.gmra.mrb[0].mxu0 %v65_v15  ;;  %1520 = vmatmul.mubr.bf16.vlgmr.msra.gmra.mrb[0].mxu1 %v65_v15  ;;  %v53_v15 = vld [vmem:[%s2784_s0 + $0x20] sm:$0xff] }
  0xa8   :  { %1359 = vmatpush1.bf16.msra.mxu0 %v2487_v13  ;;  %1531 = vmatpush1.bf16.msra.mxu1 %v2490_v14  ;;  %v2577_v13 = vld [vmem:[#allocation2 + $0x5e0] ss:$16 sps:$4 sm:$0xff]   ;;  %v2580_v14 = vld [vmem:[#allocation2 + $0x5e8] ss:$16 sps:$4 sm:$0xff]  }
  0xa9   :  { %1360 = vmatprep.subr.bf16.mxu0 %v2495_v16  ;;  %1532 = vmatprep.subr.bf16.mxu1 %v2498_v17  ;;  %v60_v16 = vld [vmem:[%s2784_s0 + $0x58] sm:$0xff]  ;;  %v2585_v17 = vld [vmem:[#allocation2 + $0x604] ss:$16 sps:$4 sm:$0xff]  }
  0xaa   :  { %1390 = vmatprep.mubr.bf16.mxu0 %v68_v23  ;;  %1562 = vmatprep.mubr.bf16.mxu1 %v68_v23  ;;  %v2590_v23 = vld [vmem:[#allocation4 + $0xc0] sm:$0xff]  }
  0xac   :  { %1361 = vmatpush1.bf16.msra.mxu0 %v2493_v19  ;;  %1533 = vmatpush1.bf16.msra.mxu1 %v2496_v20  ;;  %v67_v19 = vpack.c.bf16 %v60_v16, %v53_v15  ;;  %v2583_v20 = vld [vmem:[#allocation2 + $0x600] ss:$16 sps:$4 sm:$0xff]  }
  0xad   :  { %1362 = vmatprep.subr.bf16.mxu0 %v2501_v22  ;;  %1534 = vmatprep.subr.bf16.mxu1 %v2504_v24  ;;  %v2589_v22 = vld [vmem:[#allocation4 + $0x40] sm:$0xff]   ;;  %v2675_v24 = vmov 0  }
  0xb0   :  { %1363 = vmatpush1.bf16.msra.mxu0 %v2499_v25  ;;  %1535 = vmatpush1.bf16.msra.mxu1 %v2502_v26  ;;  %v55_v25 = vld [vmem:[%s2784_s0 + $0x30] sm:$0xff]  ;;  %v62_v26 = vld [vmem:[%s2784_s0 + $0x68] sm:$0xff] }
  0xb1   :  { %1364 = vmatprep.subr.bf16.mxu0 %v2507_v27  ;;  %1536 = vmatprep.subr.bf16.mxu1 %v2510_v28  ;;  %v69_v27 = vpack.c.bf16 %v62_v26, %v55_v25  ;;  %v2591_v28 = vld [vmem:[#allocation4] sm:$0xff]  }
  0xb4   :  { %1365 = vmatpush1.bf16.msra.mxu0 %v2505_v29  ;;  %1537 = vmatpush1.bf16.msra.mxu1 %v2508_v30  ;;  %v2592_v29 = vld [vmem:[#allocation4 + $0x80] sm:$0xff]   ;;  %v2593_v30 = vld [vmem:[#allocation4 + $0x48] sm:$0xff]  }
  0xb5   :  { %1366 = vmatprep.subr.bf16.mxu0 %v2513_v31  ;;  %1538 = vmatprep.subr.bf16.mxu1 %v2516_v32  ;;  %v2594_v31 = vld [vmem:[#allocation4 + $0xc8] sm:$0xff]  }
  0xb6   :  { %v2595_v32 = vld [vmem:[#allocation4 + $0x8] sm:$0xff]  }
  0xb8   :  { %1367 = vmatpush1.bf16.msra.mxu0 %v2511_v33  ;;  %1539 = vmatpush1.bf16.msra.mxu1 %v2514_v34  ;;  %v2596_v33 = vld [vmem:[#allocation4 + $0x88] sm:$0xff]   ;;  %v2597_v34 = vld [vmem:[#allocation4 + $0x50] sm:$0xff]  }
  0xb9   :  { %1368 = vmatprep.subr.bf16.mxu0 %v2519_v35  ;;  %1540 = vmatprep.subr.bf16.mxu1 %v2522_v36  ;;  %v2598_v35 = vld [vmem:[#allocation4 + $0xd0] sm:$0xff]  }
  0xba   :  { %v2599_v36 = vld [vmem:[#allocation4 + $0x10] sm:$0xff]  }
  0xbc   :  { %1369 = vmatpush1.bf16.msra.mxu0 %v2517_v37  ;;  %1541 = vmatpush1.bf16.msra.mxu1 %v2520_v38  ;;  %v2600_v37 = vld [vmem:[#allocation4 + $0x90] sm:$0xff]   ;;  %v2601_v38 = vld [vmem:[#allocation4 + $0x58] sm:$0xff]  }
  0xbd   :  { %1370 = vmatprep.subr.bf16.mxu0 %v2525_v39  ;;  %1542 = vmatprep.subr.bf16.mxu1 %v2528_v40  ;;  %v2602_v39 = vld [vmem:[#allocation4 + $0xd8] sm:$0xff]  }
  0xbe   :  { %v2603_v40 = vld [vmem:[#allocation4 + $0x18] sm:$0xff]  }
  0xc0   :  { %1371 = vmatpush1.bf16.msra.mxu0 %v2523_v41  ;;  %1543 = vmatpush1.bf16.msra.mxu1 %v2526_v42  ;;  %v2604_v41 = vld [vmem:[#allocation4 + $0x98] sm:$0xff]   ;;  %v2605_v42 = vld [vmem:[#allocation4 + $0x60] sm:$0xff]  }
  0xc1   :  { %1372 = vmatprep.subr.bf16.mxu0 %v2531_v43  ;;  %1544 = vmatprep.subr.bf16.mxu1 %v2534_v44  ;;  %v2606_v43 = vld [vmem:[#allocation4 + $0xe0] sm:$0xff]  }
  0xc2   :  { %v2607_v44 = vld [vmem:[#allocation4 + $0x20] sm:$0xff]  }
  0xc4   :  { %1373 = vmatpush1.bf16.msra.mxu0 %v2529_v45  ;;  %1545 = vmatpush1.bf16.msra.mxu1 %v2532_v46  ;;  %v2608_v45 = vld [vmem:[#allocation4 + $0xa0] sm:$0xff]   ;;  %v2609_v46 = vld [vmem:[#allocation4 + $0x68] sm:$0xff]  }
  0xc5   :  { %1374 = vmatprep.subr.bf16.mxu0 %v2537_v47  ;;  %1546 = vmatprep.subr.bf16.mxu1 %v2540_v48  ;;  %v2610_v47 = vld [vmem:[#allocation4 + $0xe8] sm:$0xff]  }
  0xc6   :  { %v2611_v48 = vld [vmem:[#allocation4 + $0x28] sm:$0xff]  }
  0xc8   :  { %1375 = vmatpush1.bf16.msra.mxu0 %v2535_v49  ;;  %1547 = vmatpush1.bf16.msra.mxu1 %v2538_v50  ;;  %v2612_v49 = vld [vmem:[#allocation4 + $0xa8] sm:$0xff]   ;;  %v2613_v50 = vld [vmem:[#allocation4 + $0x70] sm:$0xff]  }
  0xc9   :  { %1376 = vmatprep.subr.bf16.mxu0 %v2543_v51  ;;  %1548 = vmatprep.subr.bf16.mxu1 %v2546_v52  ;;  %v2614_v51 = vld [vmem:[#allocation4 + $0xf0] sm:$0xff]  }
  0xca   :  { %v2615_v52 = vld [vmem:[#allocation4 + $0x30] sm:$0xff]  }
  0xcc   :  { %1377 = vmatpush1.bf16.msra.mxu0 %v2541_v53  ;;  %1549 = vmatpush1.bf16.msra.mxu1 %v2544_v54  ;;  %v2616_v53 = vld [vmem:[#allocation4 + $0xb0] sm:$0xff]   ;;  %v2617_v54 = vld [vmem:[#allocation4 + $0x78] sm:$0xff]  }
  0xcd   :  { %1378 = vmatprep.subr.bf16.mxu0 %v2549_v55  ;;  %1550 = vmatprep.subr.bf16.mxu1 %v2552_v56  ;;  %v2618_v55 = vld [vmem:[#allocation4 + $0xf8] sm:$0xff]  }
  0xce   :  { %v2619_v56 = vld [vmem:[#allocation4 + $0x38] sm:$0xff]  }
  0xd0   :  { %1379 = vmatpush1.bf16.msra.mxu0 %v2547_v57  ;;  %1551 = vmatpush1.bf16.msra.mxu1 %v2550_v58  ;;  %v2620_v57 = vld [vmem:[#allocation4 + $0xb8] sm:$0xff]   ;;  %v268_v58 = vlaneseq }
  0xd1   :  { %1380 = vmatprep.subr.bf16.mxu0 %v2555_v59  ;;  %1552 = vmatprep.subr.bf16.mxu1 %v2558_v60 }
  0xd2   :  { %v269_v59 = vshrl.u32 %v268_v58, 7 }
  0xd4   :  { %1381 = vmatpush1.bf16.msra.mxu0 %v2553_v61  ;;  %1553 = vmatpush1.bf16.msra.mxu1 %v2556_v62  ;;  %v270_v60 = vsub.s32 0, %v269_v59  ;;  %v278_v61 = vsub.s32 2, %v269_v59  ;;  %v266_v62 = vld [vmem:[%s2786_s2] sm:$0xf] }
  0xd5   :  { %1382 = vmatprep.subr.bf16.mxu0 %v2561_v63  ;;  %1554 = vmatprep.subr.bf16.mxu1 %v2564_v0  ;;  %v274_v63 = vsub.s32 1, %v269_v59  ;;  %v282_v0 = vsub.s32 3, %v269_v59 }
  0xd8   :  { %1383 = vmatpush1.bf16.msra.mxu0 %v2559_v1  ;;  %1555 = vmatpush1.bf16.msra.mxu1 %v2562_v2  ;;  %v271_v1 = vrot.slane %v266_v62, %v270_v60  ;;  %v279_v2 = vrot.slane %v266_v62, %v278_v61 }
  0xd9   :  { %1384 = vmatprep.subr.bf16.mxu0 %v2567_v3  ;;  %1556 = vmatprep.subr.bf16.mxu1 %v2570_v4  ;;  %v275_v3 = vrot.slane %v266_v62, %v274_v63  ;;  %v283_v4 = vrot.slane %v266_v62, %v282_v0 }
  0xdc   :  { %1385 = vmatpush1.bf16.msra.mxu0 %v2565_v5  ;;  %1557 = vmatpush1.bf16.msra.mxu1 %v2568_v6 }
  0xdd   :  { %1386 = vmatprep.subr.bf16.mxu0 %v2573_v7  ;;  %1558 = vmatprep.subr.bf16.mxu1 %v2576_v8 }
  0xe0   :  { %1387 = vmatpush1.bf16.msra.mxu0 %v2571_v9  ;;  %1559 = vmatpush1.bf16.msra.mxu1 %v2574_v10 }
  0xe1   :  { %1388 = vmatprep.subr.bf16.mxu0 %v2579_v11  ;;  %1560 = vmatprep.subr.bf16.mxu1 %v2582_v12 }
  0xe4   :  { %1389 = vmatpush1.bf16.msra.mxu0 %v2577_v13  ;;  %1561 = vmatpush1.bf16.msra.mxu1 %v2580_v14 }
  0xe5   :  { %1401 = vmatprep.subr.bf16.mxu0 %v2585_v17  ;;  %1573 = vmatprep.subr.bf16.mxu1 %v2588_v18 }
  0xe7   :  { %1391 = vmatmul.mubr.bf16.vlgmr.msra.gmra.mrb[0].mxu0 %v67_v19  ;;  %1563 = vmatmul.mubr.bf16.vlgmr.msra.gmra.mrb[0].mxu1 %v67_v19 }
  0xe8   :  { %1402 = vmatpush1.bf16.msra.mxu0 %v2583_v20  ;;  %1574 = vmatpush1.bf16.msra.mxu1 %v2586_v21 }
  0xe9   :  { %1433 = vmatprep.mubr.bf16.mxu0 %v2675_v24  ;;  %1605 = vmatprep.mubr.bf16.mxu1 %v2675_v24 }
  0xea   :  { %2212 = vmatprep.subr.bf16.mxu0 %v2589_v22  ;;  %2234 = vmatprep.subr.bf16.mxu1 %v2590_v23 }
  0xf3   :  { %2177 = vmatmul.mubr.msk.bf16.vlgmr.msra.gmra.mrb[0].mxu0 %vm1268_vm0, %v69_v27  ;;  %2178 = vmatmul.mubr.msk.bf16.vlgmr.msra.gmra.mrb[0].mxu1 %vm1268_vm0, %v69_v27 }
  0xf4   :  { %2213 = vmatpush3.bf16.msra.mxu0 %v2591_v28  ;;  %2235 = vmatpush3.bf16.msra.mxu1 %v2592_v29 }
  0xf5   :  { %2214 = vmatprep.subr.bf16.mxu0 %v2593_v30  ;;  %2236 = vmatprep.subr.bf16.mxu1 %v2594_v31 }
  0xf8   :  { %2215 = vmatpush3.bf16.msra.mxu0 %v2595_v32  ;;  %2237 = vmatpush3.bf16.msra.mxu1 %v2596_v33 }
  0xf9   :  { %2216 = vmatprep.subr.bf16.mxu0 %v2597_v34  ;;  %2238 = vmatprep.subr.bf16.mxu1 %v2598_v35  ;;  %v2179_v35 = vld [vmem:[%s2788_s4] ss:$0 sm:$0xff] }
  0xfc   :  { %2217 = vmatpush3.bf16.msra.mxu0 %v2599_v36  ;;  %2239 = vmatpush3.bf16.msra.mxu1 %v2600_v37 }
  0xfd   :  { %2218 = vmatprep.subr.bf16.mxu0 %v2601_v38  ;;  %2240 = vmatprep.subr.bf16.mxu1 %v2602_v39 }
 0x100   :  { %2219 = vmatpush3.bf16.msra.mxu0 %v2603_v40  ;;  %2241 = vmatpush3.bf16.msra.mxu1 %v2604_v41 }
 0x101   :  { %2220 = vmatprep.subr.bf16.mxu0 %v2605_v42  ;;  %2242 = vmatprep.subr.bf16.mxu1 %v2606_v43 }
 0x104   :  { %2221 = vmatpush3.bf16.msra.mxu0 %v2607_v44  ;;  %2243 = vmatpush3.bf16.msra.mxu1 %v2608_v45 }
 0x105   :  { %2222 = vmatprep.subr.bf16.mxu0 %v2609_v46  ;;  %2244 = vmatprep.subr.bf16.mxu1 %v2610_v47 }
 0x108   :  { %2223 = vmatpush3.bf16.msra.mxu0 %v2611_v48  ;;  %2245 = vmatpush3.bf16.msra.mxu1 %v2612_v49 }
 0x109   :  { %2224 = vmatprep.subr.bf16.mxu0 %v2613_v50  ;;  %2246 = vmatprep.subr.bf16.mxu1 %v2614_v51 }
 0x10c   :  { %2225 = vmatpush3.bf16.msra.mxu0 %v2615_v52  ;;  %2247 = vmatpush3.bf16.msra.mxu1 %v2616_v53 }
 0x10d   :  { %2226 = vmatprep.subr.bf16.mxu0 %v2617_v54  ;;  %2248 = vmatprep.subr.bf16.mxu1 %v2618_v55 }
 0x110   :  { %2227 = vmatpush3.bf16.msra.mxu0 %v2619_v56  ;;  %2249 = vmatpush3.bf16.msra.mxu1 %v2620_v57 }
 0x1c6   :  { %v1435_v5 = vpop.f32.mrb[0].mxu0  ;;  %v1607_v6 = vpop.f32.mrb[0].mxu1 }
 0x1c7   :  { %v2256_v7 = vadd.f32 %v1435_v5, %v271_v1  ;;  %v2260_v8 = vadd.f32 %v1607_v6, %v279_v2  ;;  %v1437_v9 = vpop.f32.mrb[1].mxu0  ;;  %v1609_v10 = vpop.f32.mrb[1].mxu1 }
 0x1c8   :  { %v2257_v11 = vadd.f32 %v1437_v9, %v275_v3  ;;  %v2261_v12 = vadd.f32 %v1609_v10, %v283_v4  ;;  %v1439_v13 = vpop.f32.mrb[2].mxu0  ;;  %v1611_v14 = vpop.f32.mrb[2].mxu1 }
 0x1c9   :  { %v2258_v15 = vadd.f32 %v1439_v13, %v271_v1  ;;  %v2262_v16 = vadd.f32 %v1611_v14, %v279_v2  ;;  %v1441_v17 = vpop.f32.mrb[3].mxu0  ;;  %v1613_v18 = vpop.f32.mrb[3].mxu1  ;;  %v1616_v21 = vmax.f32 %v2256_v7, 0.0  ;;  %v1618_v22 = vmax.f32 %v2260_v8, 0.0 }
 0x1ca   :  { %v2259_v19 = vadd.f32 %v1441_v17, %v275_v3  ;;  %v2263_v20 = vadd.f32 %v1613_v18, %v283_v4  ;;  %v1617_v25 = vmax.f32 %v2257_v11, 0.0  ;;  %v1619_v26 = vmax.f32 %v2261_v12, 0.0 }
 0x1cb   :  { %v1620_v23 = vmax.f32 %v2258_v15, 0.0  ;;  %v1622_v24 = vmax.f32 %v2262_v16, 0.0 }
 0x1cc   :  { %v1621_v27 = vmax.f32 %v2259_v19, 0.0  ;;  %v1623_v28 = vmax.f32 %v2263_v20, 0.0 }
 0x1cd   :  { %v1624_v29 = vpack.c.bf16 %v1620_v23, %v1616_v21  ;;  %v1626_v30 = vpack.c.bf16 %v1622_v24, %v1618_v22 }
 0x1ce   :  { %v1625_v31 = vpack.c.bf16 %v1621_v27, %v1617_v25  ;;  %v1627_v32 = vpack.c.bf16 %v1623_v28, %v1619_v26 }
 0x1d0   :  { %1923 = vmatprep.mubr.bf16.mxu0 %v1625_v31  ;;  %1964 = vmatprep.mubr.bf16.mxu1 %v1627_v32 }
 0x1d1   :  { %1924 = vmatmul.mubr.bf16.vlgmr.msra.gmra.mrb[4].mxu0 %v1624_v29  ;;  %1965 = vmatmul.mubr.bf16.vlgmr.msra.gmra.mrb[4].mxu1 %v1626_v30 }
 0x2a4   :  { %v2228_v33 = vpop.f32.mrb[4].mxu0  ;;  %v2250_v34 = vpop.f32.mrb[4].mxu1 }
 0x2a5   :  { %v2229_v36 = vpop.f32.mrb[5].mxu0  ;;  %v2251_v37 = vpop.f32.mrb[5].mxu1 }
 0x2a6   :  { %v2230_v38 = vadd.f32 %v2229_v36, %v2228_v33  ;;  %v2252_v39 = vadd.f32 %v2251_v37, %v2250_v34  ;;  %v2231_v40 = vpop.f32.mrb[6].mxu0  ;;  %v2253_v41 = vpop.f32.mrb[6].mxu1 }
 0x2a7   :  { %v2232_v42 = vpop.f32.mrb[7].mxu0  ;;  %v2254_v43 = vpop.f32.mrb[7].mxu1 }
 0x2a8   :  { %v1926_v44 = vadd.f32 %v2230_v38, %v2179_v35  ;;  %v2233_v45 = vadd.f32 %v2232_v42, %v2231_v40  ;;  %v2255_v46 = vadd.f32 %v2254_v43, %v2253_v41 }
 0x2aa   :  { %v1967_v47 = vadd.f32 %v2252_v39, %v1926_v44  ;;  %v1929_v48 = vadd.f32 %v2233_v45, %v2179_v35 }
 0x2ac   :  { %1973 = vst [vmem:[%s2789_s5] sm:$0xff] %v1967_v47  ;;  %v1970_v49 = vadd.f32 %v2255_v46, %v1929_v48 }
 0x2ae   :  { %1974 = vst [vmem:[%s2789_s5 + $0x8] sm:$0xff] %v1970_v49 }
 0x2af   :  { %1979 = vsyncpa [#allocation3], 1 }
 0x2b0   :  { %1980 = vsyncpa [#allocation5], 1 }

</bundles_post_ra>
